<compile_context>
chip_gen: v6e
topology: v6e:2x2x1
jax: 0.10.0
libtpu: 0.0.40
codegen_flags: <defaults>
</compile_context>

<pallas_src>
import functools

import jax
import jax.numpy as jnp
import numpy as np
from jax.experimental import pallas as pl
from jax.experimental.pallas import tpu as pltpu


def _round_up(x, m):
    return ((x + m - 1) // m) * m


def _default_vmem_limit():
    # ~70% of physical VMEM (v5e/v6e: ~90 MiB, v7x: ~44 MiB), capped at 100 MiB.
    try:
        cap = pltpu.get_tpu_info().vmem_capacity_bytes
    except Exception:
        cap = 64 * 1024 * 1024
    return int(min(100 * 2**20, cap * 7 // 10))


_VMEM_LIMIT = _default_vmem_limit()


def _make_convt_gelu_stats_kernel(approx_gelu):
    inv_sqrt2 = 0.7071067811865476
    c0 = 0.7978845608028654  # sqrt(2/pi)
    c1 = 0.044715

    def kernel(p_ref, w_ref, y_ref, sum_ref, ssq_ref):
        # One lane-dense matmul folds every kernel tap and every output phase:
        # (r_blk, KW*KW*Cin) @ (KW*KW*Cin, s*s*Cout_pad), f32 accumulation.
        acc = jnp.dot(p_ref[...], w_ref[...], preferred_element_type=jnp.float32)
        if approx_gelu:
            # tanh approximation -> EUP slot (opt-in; deviates from PyTorch exact GELU)
            y = 0.5 * acc * (1.0 + jnp.tanh(c0 * (acc + c1 * acc * acc * acc)))
        else:
            # exact erf GELU (PyTorch nn.GELU default)
            y = 0.5 * acc * (1.0 + jax.lax.erf(acc * inv_sqrt2))
        y_ref[...] = y.astype(y_ref.dtype)  # lane-dense (optionally bf16) store
        # Per-block BN partial moments in f32; reduced in the wrapper so the grid
        # axis carries no cross-step state and stays "parallel".
        sum_ref[0] = jnp.sum(y, axis=0, keepdims=True)
        ssq_ref[0] = jnp.sum(y * y, axis=0, keepdims=True)

    return kernel


@functools.partial(
    jax.jit,
    static_argnames=("stride", "padding", "eps", "mxu_dtype", "act_dtype",
                     "approx_gelu", "row_block"))
def conv_transpose_gelu_bn(x_nchw, w_pt, gamma, beta, *, stride, padding,
                           eps=1e-5, mxu_dtype=jnp.bfloat16,
                           act_dtype=jnp.bfloat16, approx_gelu=False,
                           row_block=512):
    """ConvTranspose2d(bias=False) -> GELU -> BatchNorm2d (train-mode batch stats)."""
    N, Cin, H, W = x_nchw.shape
    Cin_w, Cout, K, K2 = w_pt.shape
    assert Cin == Cin_w and K == K2, "square kernel expected"
    s, p = stride, padding
    H_out = (H - 1) * s - 2 * p + K
    W_out = (W - 1) * s - 2 * p + K
    # TODO(synk): support H_out/W_out not divisible by stride (unequal per-phase extents).
    assert H_out % s == 0 and W_out % s == 0
    H_ph, W_ph = H_out // s, W_out // s
    Kc = -(-K // s)  # taps per phase

    # ---- phase geometry ---------------------------------------------------------
    # Output pixel (s*oh+dh) reads input rows oh + q0[dh] - jh with kh = r(dh)+s*jh.
    q0 = [(d + p) // s for d in range(s)]
    q_min, q_max = min(q0), max(q0)
    KW = q_max - q_min + Kc                 # dense window covering all phases' taps
    pad_lo = max(0, Kc - 1 - q_min)
    base = max(0, q_min - (Kc - 1))
    pad_hi_h = max(0, q_max + H_ph - H)
    pad_hi_w = max(0, q_max + W_ph - W)

    # ---- dense-window weight (KW*KW*Cin, s*s*Cout) via ONE einsum (no .at[] loops)
    Sh = np.zeros((s, KW, K), np.float32)   # tiny trace-time selection tensor
    for d in range(s):
        r = (d + p) % s
        c = q0[d] - q_min + Kc - 1
        for wh in range(KW):
            j = c - wh
            if 0 <= j < Kc and r + s * j < K:
                Sh[d, wh, r + s * j] = 1.0
    # indices: a=dh b=dw h=wh w=ww k=kh l=kw i=cin o=cout  ->  (wh, ww, ci, dh, dw, co)
    wd = jnp.einsum("ahk,bwl,iokl->hwiabo", Sh, Sh, w_pt.astype(jnp.float32))
    Cfull = s * s * Cout
    lane_mult = 128 if Cfull <= 128 else 256   # fill the 256-wide v6e/v7x MXU
    Cop = _round_up(Cfull, lane_mult)
    Cdim = KW * KW * Cin
    wd = jnp.pad(wd.reshape(Cdim, Cfull), ((0, 0), (0, Cop - Cfull))).astype(mxu_dtype)

    # ---- input: NCHW -> NHWC, small halo pad, im2col as one fused XLA gather -----
    x = jnp.transpose(x_nchw, (0, 2, 3, 1))
    xp = jnp.pad(x, ((0, 0), (pad_lo, pad_hi_h), (pad_lo, pad_hi_w), (0, 0)))
    pieces = [xp[:, base + wh: base + wh + H_ph, base + ww: base + ww + W_ph, :]
              for wh in range(KW) for ww in range(KW)]
    patches = jnp.stack(pieces, axis=3).reshape(N * H_ph * W_ph, Cdim)

    # ---- row tiling: large per-dot M, bounded VMEM per step, "parallel" grid -----
    M_tot = N * H_ph * W_ph
    r_blk = _round_up(min(row_block, _round_up(M_tot, 16)), 16)
    M_pad = _round_up(M_tot, r_blk)
    G = M_pad // r_blk
    # Zero rows contribute GELU(0)=0 to outputs and stats, so padding is harmless.
    patches = jnp.pad(patches, ((0, M_pad - M_tot), (0, 0))).astype(mxu_dtype)

    kernel = _make_convt_gelu_stats_kernel(approx_gelu)
    y_flat, psum, pssq = pl.pallas_call(
        kernel,
        out_shape=(
            jax.ShapeDtypeStruct((M_pad, Cop), act_dtype),
            jax.ShapeDtypeStruct((G, 1, Cop), jnp.float32),
            jax.ShapeDtypeStruct((G, 1, Cop), jnp.float32),
        ),
        grid_spec=pltpu.PrefetchScalarGridSpec(
            num_scalar_prefetch=0,
            grid=(G,),
            in_specs=[
                pl.BlockSpec((r_blk, Cdim), lambda i: (i, 0)),
                pl.BlockSpec((Cdim, Cop), lambda i: (0, 0)),
            ],
            out_specs=[
                pl.BlockSpec((r_blk, Cop), lambda i: (i, 0)),
                pl.BlockSpec((1, 1, Cop), lambda i: (i, 0, 0)),
                pl.BlockSpec((1, 1, Cop), lambda i: (i, 0, 0)),
            ],
        ),
        compiler_params=pltpu.CompilerParams(
            dimension_semantics=("parallel",),
            vmem_limit_bytes=_VMEM_LIMIT,
        ),
    )(patches, wd)

    # ---- BatchNorm2d batch statistics (biased variance, training mode) -----------
    # TODO(synk): E[y^2]-E[y]^2 can cancel when |mean|>>std; use Welford for production.
    count = float(N * H_out * W_out)
    csum = jnp.sum(psum[:, 0, :Cfull], axis=0).reshape(s * s, Cout).sum(axis=0)
    cssq = jnp.sum(pssq[:, 0, :Cfull], axis=0).reshape(s * s, Cout).sum(axis=0)
    mean = csum / count
    var = jnp.maximum(cssq / count - mean * mean, 0.0)
    scale = gamma.astype(jnp.float32) * jax.lax.rsqrt(var + eps)
    shift = beta.astype(jnp.float32) - mean * scale

    # ---- BN affine folded into the mandatory pixel-shuffle / crop / NCHW copy ----
    y = y_flat[:M_tot, :Cfull].astype(jnp.float32)
    y6 = y.reshape(N, H_ph, W_ph, s, s, Cout) * scale + shift
    out = jnp.transpose(y6, (0, 5, 1, 3, 2, 4)).reshape(N, Cout, H_out, W_out)
    return out


def _reference(x_nchw, w_pt, gamma, beta, stride, padding, eps=1e-5):
    """Plain-JAX reference matching PyTorch semantics."""
    K = w_pt.shape[2]
    w_oihw = jnp.transpose(w_pt, (1, 0, 2, 3))[:, :, ::-1, ::-1]
    pad = K - 1 - padding
    y = jax.lax.conv_general_dilated(
        x_nchw, w_oihw, window_strides=(1, 1),
        padding=[(pad, pad), (pad, pad)],
        lhs_dilation=(stride, stride),
        dimension_numbers=("NCHW", "OIHW", "NCHW"))
    y = jax.nn.gelu(y, approximate=False)
    mean = jnp.mean(y, axis=(0, 2, 3), keepdims=True)
    var = jnp.mean((y - mean) ** 2, axis=(0, 2, 3), keepdims=True)
    yhat = (y - mean) * jax.lax.rsqrt(var + eps)
    return yhat * gamma.reshape(1, -1, 1, 1) + beta.reshape(1, -1, 1, 1)


if __name__ == "__main__":
    # ConvTranspose(in_channels=4, out_channels=8, kernel_size=4, stride=2, padding=1)
    N, Cin, H, W = 2, 4, 16, 16
    Cout, K, stride, padding = 8, 4, 2, 1

    key = jax.random.PRNGKey(0)
    kx, kw = jax.random.split(key)
    x = jax.random.normal(kx, (N, Cin, H, W), dtype=jnp.float32)
    # PyTorch ConvTranspose2d weight layout: (in_channels, out_channels, kH, kW)
    w_pt = jax.random.normal(kw, (Cin, Cout, K, K), dtype=jnp.float32) * 0.1
    gamma = jnp.ones((Cout,), jnp.float32)   # BatchNorm2d default init
    beta = jnp.zeros((Cout,), jnp.float32)

    ref = _reference(x, w_pt, gamma, beta, stride, padding)

    # Exact f32 path: parity-checked against the PyTorch-equivalent reference.
    out = conv_transpose_gelu_bn(x, w_pt, gamma, beta, stride=stride, padding=padding,
                                 mxu_dtype=jnp.float32, act_dtype=jnp.float32)
    out = jax.block_until_ready(out)
    np.testing.assert_allclose(np.asarray(out), np.asarray(ref), rtol=1e-4, atol=1e-4)
    assert out.shape == (N, Cout, (H - 1) * stride - 2 * padding + K,
                         (W - 1) * stride - 2 * padding + K)

    # Default fast path (bf16 MXU operands + bf16 activation store, f32 GELU/stats).
    # Looser tolerance reflects bf16 quantization only — an accuracy/perf trade.
    out_fast = conv_transpose_gelu_bn(x, w_pt, gamma, beta, stride=stride,
                                      padding=padding)
    out_fast = jax.block_until_ready(out_fast)
    np.testing.assert_allclose(np.asarray(out_fast), np.asarray(ref),
                               rtol=1e-1, atol=1e-1)

    print("KERNEL_OK")
</pallas_src>

<mosaic_0001>
module attributes {stable_mosaic.version = 11 : i64} {
  func.func @kernel(%arg0: i32, %arg1: memref<512x36xf32, #tpu.memory_space<vmem>>, %arg2: memref<36x128xf32, #tpu.memory_space<vmem>>, %arg3: memref<512x128xf32, #tpu.memory_space<vmem>>, %arg4: memref<1x1x128xf32, #tpu.memory_space<vmem>>, %arg5: memref<1x1x128xf32, #tpu.memory_space<vmem>>) attributes {dimension_semantics = [#tpu.dimension_semantics<parallel>], iteration_bounds = array<i64: 1>, scalar_prefetch = 0 : i64, scratch_operands = 0 : i64, tpu.core_type = #tpu.core_type<tc>, window_params = [{transform_indices = @transform_0, window_bounds = array<i64: 512, 36>}, {pipeline_mode = #tpu.pipeline_mode<synchronous>, transform_indices = @transform_1, window_bounds = array<i64: 36, 128>}, {transform_indices = @transform_2, window_bounds = array<i64: 512, 128>}, {transform_indices = @transform_3, window_bounds = array<i64: 1, 1, 128>}, {transform_indices = @transform_4, window_bounds = array<i64: 1, 1, 128>}]} {
    %c0 = arith.constant 0 : index
    %c0_0 = arith.constant 0 : index
    %0 = vector.load %arg1[%c0, %c0_0] : memref<512x36xf32, #tpu.memory_space<vmem>>, vector<512x36xf32>
    %c0_1 = arith.constant 0 : index
    %c0_2 = arith.constant 0 : index
    %1 = vector.load %arg2[%c0_1, %c0_2] : memref<36x128xf32, #tpu.memory_space<vmem>>, vector<36x128xf32>
    %cst = arith.constant dense<0.000000e+00> : vector<512x128xf32>
    %2 = tpu.matmul %0, %1, %cst {dimension_numbers = #tpu.dot_dimension_numbers<[1], [0], [0], [1], [0, 0, 1, 1], [], []>} : vector<512x36xf32>, vector<36x128xf32>, vector<512x128xf32> -> vector<512x128xf32>
    %cst_3 = arith.constant 5.000000e-01 : f32
    %3 = vector.broadcast %cst_3 : f32 to vector<512x128xf32>
    %4 = arith.mulf %3, %2 : vector<512x128xf32>
    %cst_4 = arith.constant 0.707106769 : f32
    %5 = vector.broadcast %cst_4 : f32 to vector<512x128xf32>
    %6 = arith.mulf %2, %5 : vector<512x128xf32>
    %7 = math.erf %6 : vector<512x128xf32>
    %cst_5 = arith.constant 1.000000e+00 : f32
    %8 = vector.broadcast %cst_5 : f32 to vector<512x128xf32>
    %9 = arith.addf %8, %7 : vector<512x128xf32>
    %10 = arith.mulf %4, %9 : vector<512x128xf32>
    %c0_6 = arith.constant 0 : index
    %c0_7 = arith.constant 0 : index
    %11 = vector.load %arg3[%c0_6, %c0_7] : memref<512x128xf32, #tpu.memory_space<vmem>>, vector<512x128xf32>
    tpu.vector_store %arg3[%c0_6, %c0_7], %10 {strides = array<i32>} : memref<512x128xf32, #tpu.memory_space<vmem>>, vector<512x128xf32>,
    %cst_8 = arith.constant dense<0.000000e+00> : vector<128xf32>
    %12 = vector.multi_reduction <add>, %10, %cst_8 [0] : vector<512x128xf32> to vector<128xf32>
    %13 = vector.shape_cast %12 : vector<128xf32> to vector<1x128xf32>
    %c0_9 = arith.constant 0 : index
    %c0_10 = arith.constant 0 : index
    %c0_11 = arith.constant 0 : index
    %14 = vector.load %arg4[%c0_9, %c0_10, %c0_11] : memref<1x1x128xf32, #tpu.memory_space<vmem>>, vector<1x1x128xf32>
    %15 = vector.shape_cast %14 : vector<1x1x128xf32> to vector<1x128xf32>
    %16 = vector.shape_cast %13 : vector<1x128xf32> to vector<1x1x128xf32>
    tpu.vector_store %arg4[%c0_9, %c0_10, %c0_11], %16 {strides = array<i32>} : memref<1x1x128xf32, #tpu.memory_space<vmem>>, vector<1x1x128xf32>,
    %17 = arith.mulf %10, %10 : vector<512x128xf32>
    %cst_12 = arith.constant dense<0.000000e+00> : vector<128xf32>
    %18 = vector.multi_reduction <add>, %17, %cst_12 [0] : vector<512x128xf32> to vector<128xf32>
    %19 = vector.shape_cast %18 : vector<128xf32> to vector<1x128xf32>
    %c0_13 = arith.constant 0 : index
    %c0_14 = arith.constant 0 : index
    %c0_15 = arith.constant 0 : index
    %20 = vector.load %arg5[%c0_13, %c0_14, %c0_15] : memref<1x1x128xf32, #tpu.memory_space<vmem>>, vector<1x1x128xf32>
    %21 = vector.shape_cast %20 : vector<1x1x128xf32> to vector<1x128xf32>
    %22 = vector.shape_cast %19 : vector<1x128xf32> to vector<1x1x128xf32>
    tpu.vector_store %arg5[%c0_13, %c0_14, %c0_15], %22 {strides = array<i32>} : memref<1x1x128xf32, #tpu.memory_space<vmem>>, vector<1x1x128xf32>,
    return
  }
  func.func @transform_0(%arg0: i32) -> (i32, i32) {
    %c0_i32 = arith.constant 0 : i32
    %c0_i32_0 = arith.constant 0 : i32
    return %arg0, %c0_i32 : i32, i32
  }
  func.func @transform_1(%arg0: i32) -> (i32, i32) {
    %c0_i32 = arith.constant 0 : i32
    %c0_i32_0 = arith.constant 0 : i32
    %c0_i32_1 = arith.constant 0 : i32
    return %c0_i32, %c0_i32_0 : i32, i32
  }
  func.func @transform_2(%arg0: i32) -> (i32, i32) {
    %c0_i32 = arith.constant 0 : i32
    %c0_i32_0 = arith.constant 0 : i32
    return %arg0, %c0_i32 : i32, i32
  }
  func.func @transform_3(%arg0: i32) -> (i32, i32, i32) {
    %c0_i32 = arith.constant 0 : i32
    %c0_i32_0 = arith.constant 0 : i32
    %c0_i32_1 = arith.constant 0 : i32
    return %arg0, %c0_i32, %c0_i32_0 : i32, i32, i32
  }
  func.func @transform_4(%arg0: i32) -> (i32, i32, i32) {
    %c0_i32 = arith.constant 0 : i32
    %c0_i32_0 = arith.constant 0 : i32
    %c0_i32_1 = arith.constant 0 : i32
    return %arg0, %c0_i32, %c0_i32_0 : i32, i32, i32
  }
}

</mosaic_0001>

<bundles_post_ra>
// kernel: conv_transpose_gelu_bn.1
= control target key start
LH: loop header
LB: loop body
LE: loop exit
PB: predicated region body
PF: predicated region fallthrough
CT: control target
= control target key end

     0   :  { %vm276_vm0 = vcmask 1043456   ;;  %vm83_vm1 = vcmask 293888   ;;  %s2566_s1 = inlined_call_operand.vmem [shape: f32[36,128], index: 1, kind: input, shape index: {}]   ;;  %s2567_s0 = inlined_call_operand.vmem [shape: f32[512,36], index: 0, kind: input, shape index: {}]   ;;  %s2568_s2 = inlined_call_operand.vmem [shape: f32[512,128], index: 2, kind: output, shape index: {0}]   ;;  %s2569_s3 = inlined_call_operand.vmem [shape: f32[1,1,128], index: 3, kind: output, shape index: {1}]   ;;  %s2570_s4 = inlined_call_operand.vmem [shape: f32[1,1,128], index: 4, kind: output, shape index: {2}]  }
   0x1   :  { %v82_v0 = vld [vmem:[%s2566_s1 + $0x20] sm:$0xf]  ;;  %v81_v1 = vld [vmem:[%s2566_s1 + $0x18] sm:$0xff]  ;;  %v80_v3 = vld [vmem:[%s2566_s1 + $0x10] sm:$0xff] }
   0x2   :  { %1399 = vmatprep.subr.msk.mxu0 %vm276_vm0, %v82_v0  ;;  %v14_v2 = vld [vmem:[%s2567_s0] sm:$0xff]  ;;  %1505 = vmatprep.subr.msk.mxu1 %vm276_vm0, %v82_v0  ;;  %v79_v4 = vld [vmem:[%s2566_s1 + $0x8] sm:$0xff]  ;;  %v16_v7 = vld [vmem:[%s2567_s0 + $0x10] sm:$0xff] }
   0x3   :  { %1400 = vmatpush3.msk.msra.mxu0 %vm276_vm0, %v82_v0  ;;  %1409 = vmatprep.mubr.msk.f32.mxu0 %vm83_vm1, %v14_v2  ;;  %v78_v5 = vld [vmem:[%s2566_s1] sm:$0xff]  ;;  %v15_v6 = vld [vmem:[%s2567_s0 + $0x8] sm:$0xff]  ;;  %v48_v10 = vld [vmem:[%s2567_s0 + $0x110] sm:$0xff] }
   0x4   :  { %1401 = vmatprep.subr.mxu0 %v81_v1  ;;  %1510 = vmatpush3.msk.msra.mxu1 %vm276_vm0, %v82_v0  ;;  %v46_v8 = vld [vmem:[%s2567_s0 + $0x100] sm:$0xff]  ;;  %v47_v9 = vld [vmem:[%s2567_s0 + $0x108] sm:$0xff]  ;;  %v17_v11 = vld [vmem:[%s2567_s0 + $0x18] sm:$0xff] }
   0x5   :  { %1402 = vmatpush3.msra.mxu0 %v81_v1  ;;  %1506 = vmatprep.subr.mxu1 %v81_v1  ;;  %v18_v12 = vld [vmem:[%s2567_s0 + $0x20] sm:$0xff]  ;;  %v49_v13 = vld [vmem:[%s2567_s0 + $0x118] sm:$0xff]  ;;  %v19_v15 = vld [vmem:[%s2567_s0 + $0x28] sm:$0xff] }
   0x6   :  { %1403 = vmatprep.subr.mxu0 %v80_v3  ;;  %1511 = vmatpush3.msra.mxu1 %v81_v1  ;;  %v50_v14 = vld [vmem:[%s2567_s0 + $0x120] sm:$0xff]  ;;  %v20_v16 = vld [vmem:[%s2567_s0 + $0x30] sm:$0xff]  ;;  %v51_v17 = vld [vmem:[%s2567_s0 + $0x128] sm:$0xff] }
   0x7   :  { %1404 = vmatpush3.msra.mxu0 %v80_v3  ;;  %1507 = vmatprep.subr.mxu1 %v80_v3  ;;  %v52_v18 = vld [vmem:[%s2567_s0 + $0x130] sm:$0xff]  ;;  %v21_v19 = vld [vmem:[%s2567_s0 + $0x38] sm:$0xff]  ;;  %v22_v20 = vld [vmem:[%s2567_s0 + $0x40] sm:$0xff] }
   0x8   :  { %1405 = vmatprep.subr.mxu0 %v79_v4  ;;  %1512 = vmatpush3.msra.mxu1 %v80_v3  ;;  %v53_v21 = vld [vmem:[%s2567_s0 + $0x138] sm:$0xff]  ;;  %v54_v22 = vld [vmem:[%s2567_s0 + $0x140] sm:$0xff]  ;;  %v23_v23 = vld [vmem:[%s2567_s0 + $0x48] sm:$0xff] }
   0x9   :  { %1406 = vmatpush3.msra.mxu0 %v79_v4  ;;  %1508 = vmatprep.subr.mxu1 %v79_v4  ;;  %v24_v24 = vld [vmem:[%s2567_s0 + $0x50] sm:$0xff]  ;;  %v55_v25 = vld [vmem:[%s2567_s0 + $0x148] sm:$0xff]  ;;  %v25_v27 = vld [vmem:[%s2567_s0 + $0x58] sm:$0xff] }
   0xa   :  { %1407 = vmatprep.subr.mxu0 %v78_v5  ;;  %1513 = vmatpush3.msra.mxu1 %v79_v4  ;;  %v56_v26 = vld [vmem:[%s2567_s0 + $0x150] sm:$0xff]  ;;  %v26_v28 = vld [vmem:[%s2567_s0 + $0x60] sm:$0xff]  ;;  %v57_v29 = vld [vmem:[%s2567_s0 + $0x158] sm:$0xff] }
   0xb   :  { %1408 = vmatpush3.msra.mxu0 %v78_v5  ;;  %1509 = vmatprep.subr.mxu1 %v78_v5  ;;  %v58_v30 = vld [vmem:[%s2567_s0 + $0x160] sm:$0xff]  ;;  %v27_v31 = vld [vmem:[%s2567_s0 + $0x68] sm:$0xff]  ;;  %v28_v32 = vld [vmem:[%s2567_s0 + $0x70] sm:$0xff] }
   0xc   :  { %1410 = vmatmul.mubr.msk.f32.vlgmr.msra.gmra.mxu0 %vm83_vm1, %v15_v6  ;;  %1514 = vmatpush3.msra.mxu1 %v78_v5  ;;  %v59_v33 = vld [vmem:[%s2567_s0 + $0x168] sm:$0xff]  ;;  %v60_v34 = vld [vmem:[%s2567_s0 + $0x170] sm:$0xff]  ;;  %v29_v35 = vld [vmem:[%s2567_s0 + $0x78] sm:$0xff] }
   0xd   :  { %1412 = vmatprep.mubr.msk.f32.mxu0 %vm83_vm1, %v16_v7  ;;  %1457 = vmatprep.mubr.msk.f32.mxu1 %vm83_vm1, %v46_v8  ;;  %v30_v36 = vld [vmem:[%s2567_s0 + $0x80] sm:$0xff]  ;;  %v61_v37 = vld [vmem:[%s2567_s0 + $0x178] sm:$0xff]  ;;  %v31_v39 = vld [vmem:[%s2567_s0 + $0x88] sm:$0xff] }
   0xe   :  { %1458 = vmatmul.mubr.msk.f32.vlgmr.msra.gmra.mxu1 %vm83_vm1, %v47_v9  ;;  %v62_v38 = vld [vmem:[%s2567_s0 + $0x180] sm:$0xff]  ;;  %v32_v40 = vld [vmem:[%s2567_s0 + $0x90] sm:$0xff]  ;;  %v63_v41 = vld [vmem:[%s2567_s0 + $0x188] sm:$0xff] }
   0xf   :  { %1460 = vmatprep.mubr.msk.f32.mxu1 %vm83_vm1, %v48_v10  ;;  %v64_v42 = vld [vmem:[%s2567_s0 + $0x190] sm:$0xff]  ;;  %v33_v43 = vld [vmem:[%s2567_s0 + $0x98] sm:$0xff]  ;;  %v34_v44 = vld [vmem:[%s2567_s0 + $0xa0] sm:$0xff] }
  0x10   :  { %1413 = vmatmul.mubr.msk.f32.gmra.mxu0 %vm83_vm1, %v17_v11  ;;  %v65_v45 = vld [vmem:[%s2567_s0 + $0x198] sm:$0xff]  ;;  %v66_v46 = vld [vmem:[%s2567_s0 + $0x1a0] sm:$0xff]  ;;  %v35_v47 = vld [vmem:[%s2567_s0 + $0xa8] sm:$0xff] }
  0x11   :  { %1415 = vmatprep.mubr.msk.f32.mxu0 %vm83_vm1, %v18_v12  ;;  %v36_v48 = vld [vmem:[%s2567_s0 + $0xb0] sm:$0xff]  ;;  %v67_v49 = vld [vmem:[%s2567_s0 + $0x1a8] sm:$0xff]  ;;  %v37_v51 = vld [vmem:[%s2567_s0 + $0xb8] sm:$0xff] }
  0x12   :  { %1461 = vmatmul.mubr.msk.f32.gmra.mxu1 %vm83_vm1, %v49_v13  ;;  %v68_v50 = vld [vmem:[%s2567_s0 + $0x1b0] sm:$0xff]  ;;  %v38_v52 = vld [vmem:[%s2567_s0 + $0xc0] sm:$0xff]  ;;  %v69_v53 = vld [vmem:[%s2567_s0 + $0x1b8] sm:$0xff] }
  0x13   :  { %1463 = vmatprep.mubr.msk.f32.mxu1 %vm83_vm1, %v50_v14  ;;  %v70_v54 = vld [vmem:[%s2567_s0 + $0x1c0] sm:$0xff]  ;;  %v39_v55 = vld [vmem:[%s2567_s0 + $0xc8] sm:$0xff]  ;;  %v40_v56 = vld [vmem:[%s2567_s0 + $0xd0] sm:$0xff] }
  0x14   :  { %1416 = vmatmul.mubr.msk.f32.gmra.mxu0 %vm83_vm1, %v19_v15  ;;  %v71_v57 = vld [vmem:[%s2567_s0 + $0x1c8] sm:$0xff]  ;;  %v72_v58 = vld [vmem:[%s2567_s0 + $0x1d0] sm:$0xff]  ;;  %v41_v59 = vld [vmem:[%s2567_s0 + $0xd8] sm:$0xff] }
  0x15   :  { %1418 = vmatprep.mubr.msk.f32.mxu0 %vm83_vm1, %v20_v16  ;;  %v42_v60 = vld [vmem:[%s2567_s0 + $0xe0] sm:$0xff]  ;;  %v73_v61 = vld [vmem:[%s2567_s0 + $0x1d8] sm:$0xff]  ;;  %v43_v63 = vld [vmem:[%s2567_s0 + $0xe8] sm:$0xff] }
  0x16   :  { %1464 = vmatmul.mubr.msk.f32.gmra.mxu1 %vm83_vm1, %v51_v17  ;;  %v74_v62 = vld [vmem:[%s2567_s0 + $0x1e0] sm:$0xff]  ;;  %v44_v0 = vld [vmem:[%s2567_s0 + $0xf0] sm:$0xff]  ;;  %v75_v1 = vld [vmem:[%s2567_s0 + $0x1e8] sm:$0xff] }
  0x17   :  { %1466 = vmatprep.mubr.msk.f32.mxu1 %vm83_vm1, %v52_v18  ;;  %v76_v2 = vld [vmem:[%s2567_s0 + $0x1f0] sm:$0xff]  ;;  %v45_v3 = vld [vmem:[%s2567_s0 + $0xf8] sm:$0xff] }
  0x18   :  { %1419 = vmatmul.mubr.msk.f32.gmra.mxu0 %vm83_vm1, %v21_v19  ;;  %v77_v4 = vld [vmem:[%s2567_s0 + $0x1f8] sm:$0xff] }
  0x19   :  { %1421 = vmatprep.mubr.msk.f32.mxu0 %vm83_vm1, %v22_v20 }
  0x1a   :  { %1467 = vmatmul.mubr.msk.f32.gmra.mxu1 %vm83_vm1, %v53_v21 }
  0x1b   :  { %1469 = vmatprep.mubr.msk.f32.mxu1 %vm83_vm1, %v54_v22 }
  0x1c   :  { %1422 = vmatmul.mubr.msk.f32.gmra.mxu0 %vm83_vm1, %v23_v23 }
  0x1d   :  { %1424 = vmatprep.mubr.msk.f32.mxu0 %vm83_vm1, %v24_v24 }
  0x1e   :  { %1470 = vmatmul.mubr.msk.f32.gmra.mxu1 %vm83_vm1, %v55_v25 }
  0x1f   :  { %1472 = vmatprep.mubr.msk.f32.mxu1 %vm83_vm1, %v56_v26 }
  0x20   :  { %1425 = vmatmul.mubr.msk.f32.gmra.mxu0 %vm83_vm1, %v25_v27 }
  0x21   :  { %1427 = vmatprep.mubr.msk.f32.mxu0 %vm83_vm1, %v26_v28 }
  0x22   :  { %1473 = vmatmul.mubr.msk.f32.gmra.mxu1 %vm83_vm1, %v57_v29 }
  0x23   :  { %1475 = vmatprep.mubr.msk.f32.mxu1 %vm83_vm1, %v58_v30 }
  0x24   :  { %1428 = vmatmul.mubr.msk.f32.gmra.mxu0 %vm83_vm1, %v27_v31 }
  0x25   :  { %1430 = vmatprep.mubr.msk.f32.mxu0 %vm83_vm1, %v28_v32 }
  0x26   :  { %1476 = vmatmul.mubr.msk.f32.gmra.mxu1 %vm83_vm1, %v59_v33 }
  0x27   :  { %1478 = vmatprep.mubr.msk.f32.mxu1 %vm83_vm1, %v60_v34 }
  0x28   :  { %1431 = vmatmul.mubr.msk.f32.gmra.mxu0 %vm83_vm1, %v29_v35 }
  0x29   :  { %1433 = vmatprep.mubr.msk.f32.mxu0 %vm83_vm1, %v30_v36 }
  0x2a   :  { %1479 = vmatmul.mubr.msk.f32.gmra.mxu1 %vm83_vm1, %v61_v37 }
  0x2b   :  { %1481 = vmatprep.mubr.msk.f32.mxu1 %vm83_vm1, %v62_v38 }
  0x2c   :  { %1434 = vmatmul.mubr.msk.f32.gmra.mxu0 %vm83_vm1, %v31_v39 }
  0x2d   :  { %1436 = vmatprep.mubr.msk.f32.mxu0 %vm83_vm1, %v32_v40 }
  0x2e   :  { %1482 = vmatmul.mubr.msk.f32.gmra.mxu1 %vm83_vm1, %v63_v41 }
  0x2f   :  { %1484 = vmatprep.mubr.msk.f32.mxu1 %vm83_vm1, %v64_v42 }
  0x30   :  { %1437 = vmatmul.mubr.msk.f32.gmra.mxu0 %vm83_vm1, %v33_v43 }
  0x31   :  { %1439 = vmatprep.mubr.msk.f32.mxu0 %vm83_vm1, %v34_v44 }
  0x32   :  { %1485 = vmatmul.mubr.msk.f32.gmra.mxu1 %vm83_vm1, %v65_v45 }
  0x33   :  { %1487 = vmatprep.mubr.msk.f32.mxu1 %vm83_vm1, %v66_v46 }
  0x34   :  { %1440 = vmatmul.mubr.msk.f32.gmra.mxu0 %vm83_vm1, %v35_v47 }
  0x35   :  { %1442 = vmatprep.mubr.msk.f32.mxu0 %vm83_vm1, %v36_v48 }
  0x36   :  { %1488 = vmatmul.mubr.msk.f32.gmra.mxu1 %vm83_vm1, %v67_v49 }
  0x37   :  { %1490 = vmatprep.mubr.msk.f32.mxu1 %vm83_vm1, %v68_v50 }
  0x38   :  { %1443 = vmatmul.mubr.msk.f32.gmra.mxu0 %vm83_vm1, %v37_v51 }
  0x39   :  { %1445 = vmatprep.mubr.msk.f32.mxu0 %vm83_vm1, %v38_v52 }
  0x3a   :  { %1491 = vmatmul.mubr.msk.f32.gmra.mxu1 %vm83_vm1, %v69_v53 }
  0x3b   :  { %1493 = vmatprep.mubr.msk.f32.mxu1 %vm83_vm1, %v70_v54 }
  0x3c   :  { %1446 = vmatmul.mubr.msk.f32.gmra.mxu0 %vm83_vm1, %v39_v55 }
  0x3d   :  { %1448 = vmatprep.mubr.msk.f32.mxu0 %vm83_vm1, %v40_v56 }
  0x3e   :  { %1494 = vmatmul.mubr.msk.f32.gmra.mxu1 %vm83_vm1, %v71_v57 }
  0x3f   :  { %1496 = vmatprep.mubr.msk.f32.mxu1 %vm83_vm1, %v72_v58 }
  0x40   :  { %1449 = vmatmul.mubr.msk.f32.gmra.mxu0 %vm83_vm1, %v41_v59 }
  0x41   :  { %1451 = vmatprep.mubr.msk.f32.mxu0 %vm83_vm1, %v42_v60 }
  0x42   :  { %1497 = vmatmul.mubr.msk.f32.gmra.mxu1 %vm83_vm1, %v73_v61 }
  0x43   :  { %1499 = vmatprep.mubr.msk.f32.mxu1 %vm83_vm1, %v74_v62 }
  0x44   :  { %1452 = vmatmul.mubr.msk.f32.gmra.mxu0 %vm83_vm1, %v43_v63 }
  0x45   :  { %1454 = vmatprep.mubr.msk.f32.mxu0 %vm83_vm1, %v44_v0 }
  0x46   :  { %1500 = vmatmul.mubr.msk.f32.gmra.mxu1 %vm83_vm1, %v75_v1 }
  0x47   :  { %1502 = vmatprep.mubr.msk.f32.mxu1 %vm83_vm1, %v76_v2 }
  0x48   :  { %1455 = vmatmul.mubr.msk.f32.gmra.mxu0 %vm83_vm1, %v45_v3 }
  0x4a   :  { %1503 = vmatmul.mubr.msk.f32.gmra.mxu1 %vm83_vm1, %v77_v4 }
  0xcc   :  { %v1411_v5 = vpop.f32.mrf.mxu0 }
  0xcd   :  { %v730_v6 = vmul.f32 0.70710677, %v1411_v5  ;;  %v666_v27 = vmul.f32 0.5, %v1411_v5 }
  0xce   :  { %v346_v7 = vpop.f32.mrf.mxu0  ;;  %v1459_v8 = vpop.f32.mrf.mxu1 }
  0xcf   :  { %1515 = verf.f32 %v730_v6  ;;  %v729_v9 = vmul.f32 0.70710677, %v346_v7  ;;  %v762_v11 = vmul.f32 0.70710677, %v1459_v8  ;;  %v665_v29 = vmul.f32 0.5, %v346_v7 }
  0xd0   :  { %v1414_v10 = vpop.f32.mrf.mxu0  ;;  %v506_v12 = vpop.f32.mrf.mxu1  ;;  %v698_v32 = vmul.f32 0.5, %v1459_v8 }
  0xd1   :  { %1517 = verf.f32 %v729_v9  ;;  %v732_v13 = vmul.f32 0.70710677, %v1414_v10  ;;  %v761_v15 = vmul.f32 0.70710677, %v506_v12  ;;  %v668_v30 = vmul.f32 0.5, %v1414_v10 }
  0xd2   :  { %v356_v14 = vpop.f32.mrf.mxu0  ;;  %1519 = verf.f32 %v762_v11  ;;  %v1462_v16 = vpop.f32.mrf.mxu1  ;;  %v1946_v37 = vmul.f32 0.5, %v506_v12 }
  0xd3   :  { %1521 = verf.f32 %v732_v13  ;;  %v731_v17 = vmul.f32 0.70710677, %v356_v14  ;;  %v764_v25 = vmul.f32 0.70710677, %v1462_v16  ;;  %v667_v35 = vmul.f32 0.5, %v356_v14 }
  0xd4   :  { %v1417_v18 = vpop.f32.mrf.mxu0  ;;  %1523 = verf.f32 %v761_v15  ;;  %v516_v19 = vpop.f32.mrf.mxu1  ;;  %v1952_v41 = vmul.f32 0.5, %v1462_v16 }
  0xd5   :  { %1525 = verf.f32 %v731_v17  ;;  %v734_v20 = vmul.f32 0.70710677, %v1417_v18  ;;  %v763_v33 = vmul.f32 0.70710677, %v516_v19  ;;  %v1948_v39 = vmul.f32 0.5, %v1417_v18 }
  0xd6   :  { %v366_v21 = vpop.f32.mrf.mxu0  ;;  %v1465_v22 = vpop.f32.mrf.mxu1  ;;  %v1962_v50 = vmul.f32 0.5, %v516_v19 }
  0xd7   :  { %1527 = verf.f32 %v734_v20  ;;  %v733_v23 = vmul.f32 0.70710677, %v366_v21  ;;  %v766_v42 = vmul.f32 0.70710677, %v1465_v22  ;;  %v1958_v48 = vmul.f32 0.5, %v366_v21 }
  0xd8   :  { %v1420_v24 = vpop.f32.mrf.mxu0  ;;  %v1939_v26 = vpop.f32.mrf.mxu1  ;;  %v1964_v51 = vmul.f32 0.5, %v1465_v22 }
  0xd9   :  { %1529 = verf.f32 %v733_v23  ;;  %v736_v28 = vmul.f32 0.70710677, %v1420_v24  ;;  %v765_v45 = vmul.f32 0.70710677, %v1939_v26  ;;  %v1967_v57 = vmul.f32 0.5, %v1420_v24 }
  0xda   :  { %v1941_v31 = vpop.f32.mrf.mxu0  ;;  %v1943_v34 = vpop.f32.mrf.mxu1  ;;  %v1994_v14 = vmul.f32 0.5, %v1939_v26 }
  0xdb   :  { %1531 = verf.f32 %v736_v28  ;;  %v735_v36 = vmul.f32 0.70710677, %v1941_v31  ;;  %v768_v55 = vmul.f32 0.70710677, %v1943_v34 }
  0xdc   :  { %v1516_v38 = vpop.eup %1515  ;;  %v1950_v40 = vpop.f32.mrf.mxu0  ;;  %1533 = verf.f32 %v764_v25 }
  0xdd   :  { %v858_v43 = vadd.f32 1.0, %v1516_v38  ;;  %1535 = verf.f32 %v735_v36  ;;  %v738_v44 = vmul.f32 0.70710677, %v1950_v40  ;;  %v1956_v46 = vpop.f32.mrf.mxu1 }
  0xde   :  { %v1518_v47 = vpop.eup %1517  ;;  %v1960_v49 = vpop.f32.mrf.mxu0  ;;  %1537 = verf.f32 %v763_v33  ;;  %v767_v0 = vmul.f32 0.70710677, %v1956_v46  ;;  %v2020_v33 = vmul.f32 0.5, %v1943_v34 }
  0xdf   :  { %v1520_v52 = vpop.eup %1519  ;;  %v922_v53 = vmul.f32 %v858_v43, %v666_v27  ;;  %v857_v54 = vadd.f32 1.0, %v1518_v47  ;;  %1539 = verf.f32 %v738_v44  ;;  %v737_v58 = vmul.f32 0.70710677, %v1960_v49  ;;  %v1976_v1 = vpop.f32.mrf.mxu1 }
  0xe0   :  { %v1522_v56 = vpop.eup %1521  ;;  %v1970_v59 = vpop.f32.mrf.mxu0  ;;  %v890_v60 = vadd.f32 1.0, %v1520_v52  ;;  %1541 = verf.f32 %v766_v42  ;;  %v674_v44 = vmul.f32 0.5, %v1950_v40 }
  0xe1   :  { %v1524_v61 = vpop.eup %1523  ;;  %986 = vst [vmem:[%s2568_s2 + $0x8] sm:$0xff] %v922_v53  ;;  %v921_v62 = vmul.f32 %v857_v54, %v665_v29  ;;  %v860_v63 = vadd.f32 1.0, %v1522_v56  ;;  %1543 = verf.f32 %v765_v45  ;;  %v740_v3 = vmul.f32 0.70710677, %v1970_v59  ;;  %v1999_v18 = vpop.f32.mrf.mxu1 }
  0xe2   :  { %v1526_v2 = vpop.eup %1525  ;;  %1545 = verf.f32 %v737_v58  ;;  %v1979_v4 = vpop.f32.mrf.mxu0  ;;  %v1981_v5 = vmul.f32 %v890_v60, %v698_v32  ;;  %v889_v6 = vadd.f32 1.0, %v1524_v61  ;;  %v1120_v11 = vmul.f32 %v922_v53, %v922_v53 }
  0xe3   :  { %985 = vst [vmem:[%s2568_s2] sm:$0xff] %v921_v62  ;;  %v1119_v7 = vmul.f32 %v921_v62, %v921_v62  ;;  %v924_v8 = vmul.f32 %v860_v63, %v668_v30  ;;  %v859_v9 = vadd.f32 1.0, %v1526_v2  ;;  %1547 = verf.f32 %v768_v55 }
  0xe4   :  { %v1528_v10 = vpop.eup %1527  ;;  %1549 = verf.f32 %v740_v3  ;;  %v739_v12 = vmul.f32 0.70710677, %v1979_v4  ;;  %v1987_v13 = vpop.f32.mrf.mxu0  ;;  %1018 = vst [vmem:[%s2568_s2 + $0x108] sm:$0xff] %v1981_v5  ;;  %v1049_v15 = vadd.f32 %v922_v53, %v921_v62  ;;  %v2005_v23 = vmul.f32 %v889_v6, %v1946_v37 }
  0xe5   :  { %988 = vst [vmem:[%s2568_s2 + $0x18] sm:$0xff] %v924_v8  ;;  %v923_v16 = vmul.f32 %v859_v9, %v667_v35  ;;  %v862_v17 = vadd.f32 1.0, %v1528_v10  ;;  %1551 = verf.f32 %v767_v0  ;;  %v1183_v20 = vadd.f32 %v1120_v11, %v1119_v7 }
  0xe6   :  { %v1530_v19 = vpop.eup %1529  ;;  %1553 = verf.f32 %v739_v12  ;;  %v742_v21 = vmul.f32 0.70710677, %v1987_v13  ;;  %v2002_v22 = vpop.f32.mrf.mxu0  ;;  %v671_v29 = vmul.f32 0.5, %v1941_v31  ;;  %1017 = vst [vmem:[%s2568_s2 + $0x100] sm:$0xff] %v2005_v23  ;;  %v1122_v36 = vmul.f32 %v924_v8, %v924_v8 }
  0xe7   :  { %987 = vst [vmem:[%s2568_s2 + $0x10] sm:$0xff] %v923_v16  ;;  %v1050_v24 = vadd.f32 %v1049_v15, %v923_v16  ;;  %v1121_v25 = vmul.f32 %v923_v16, %v923_v16  ;;  %v926_v26 = vmul.f32 %v862_v17, %v1948_v39  ;;  %v861_v27 = vadd.f32 1.0, %v1530_v19  ;;  %v2028_v39 = vpop.f32.mrf.mxu1 }
  0xe8   :  { %v1532_v28 = vpop.eup %1531  ;;  %1555 = verf.f32 %v742_v21  ;;  %v741_v30 = vmul.f32 0.70710677, %v2002_v22  ;;  %v2013_v32 = vpop.f32.mrf.mxu0  ;;  %v2057_v9 = vmul.f32 0.5, %v1956_v46  ;;  %v676_v19 = vmul.f32 0.5, %v1970_v59 }
  0xe9   :  { %v2022_v35 = vpop.eup %1533  ;;  %v1184_v37 = vadd.f32 %v1183_v20, %v1121_v25  ;;  %990 = vst [vmem:[%s2568_s2 + $0x28] sm:$0xff] %v926_v26  ;;  %v925_v31 = vmul.f32 %v861_v27, %v1958_v48  ;;  %v1051_v38 = vadd.f32 %v1050_v24, %v924_v8  ;;  %v864_v43 = vadd.f32 1.0, %v1532_v28  ;;  %v2045_v3 = vpop.f32.mrf.mxu1 }
  0xea   :  { %v1536_v42 = vpop.eup %1535  ;;  %1557 = verf.f32 %v741_v30  ;;  %v744_v34 = vmul.f32 0.70710677, %v2013_v32  ;;  %v2032_v45 = vpop.f32.mrf.mxu0  ;;  %v1124_v56 = vmul.f32 %v926_v26, %v926_v26  ;;  %v675_v27 = vmul.f32 0.5, %v1979_v4 }
  0xeb   :  { %v2034_v47 = vpop.eup %1537  ;;  %989 = vst [vmem:[%s2568_s2 + $0x20] sm:$0xff] %v925_v31  ;;  %v1052_v52 = vadd.f32 %v1051_v38, %v925_v31  ;;  %v1123_v48 = vmul.f32 %v925_v31, %v925_v31  ;;  %v1185_v53 = vadd.f32 %v1184_v37, %v1122_v36  ;;  %v863_v54 = vadd.f32 1.0, %v1536_v42  ;;  %v2072_v28 = vpop.f32.mrf.mxu1 }
  0xec   :  { %v1540_v55 = vpop.eup %1539  ;;  %v928_v58 = vmul.f32 %v864_v43, %v1967_v57  ;;  %1559 = verf.f32 %v744_v34  ;;  %v743_v40 = vmul.f32 0.70710677, %v2032_v45  ;;  %v2041_v60 = vpop.f32.mrf.mxu0  ;;  %v673_v57 = vmul.f32 0.5, %v1960_v49 }
  0xed   :  { %v2043_v61 = vpop.eup %1541  ;;  %v1186_v62 = vadd.f32 %v1185_v53, %v1123_v48  ;;  %v927_v63 = vmul.f32 %v863_v54, %v671_v29  ;;  %v1053_v0 = vadd.f32 %v1052_v52, %v926_v26  ;;  %v866_v2 = vadd.f32 1.0, %v1540_v55 }
  0xee   :  { %v2047_v6 = vpop.eup %1543  ;;  %992 = vst [vmem:[%s2568_s2 + $0x38] sm:$0xff] %v928_v58  ;;  %1561 = verf.f32 %v743_v40  ;;  %v746_v7 = vmul.f32 0.70710677, %v2041_v60  ;;  %v2054_v8 = vpop.f32.mrf.mxu0  ;;  %v1126_v24 = vmul.f32 %v928_v58, %v928_v58  ;;  %v678_v42 = vmul.f32 0.5, %v1987_v13 }
  0xef   :  { %v1546_v10 = vpop.eup %1545  ;;  %991 = vst [vmem:[%s2568_s2 + $0x30] sm:$0xff] %v927_v63  ;;  %v1054_v11 = vadd.f32 %v1053_v0, %v927_v63  ;;  %v1125_v12 = vmul.f32 %v927_v63, %v927_v63  ;;  %v1187_v15 = vadd.f32 %v1186_v62, %v1124_v56  ;;  %v930_v16 = vmul.f32 %v866_v2, %v674_v44 }
  0xf0   :  { %v2062_v17 = vpop.eup %1547  ;;  %v865_v49 = vadd.f32 1.0, %v1546_v10  ;;  %1563 = verf.f32 %v746_v7  ;;  %v745_v20 = vmul.f32 0.70710677, %v2054_v8  ;;  %v2066_v21 = vpop.f32.mrf.mxu0  ;;  %v892_v44 = vadd.f32 1.0, %v2022_v35 }
  0xf1   :  { %v1550_v46 = vpop.eup %1549  ;;  %v1188_v25 = vadd.f32 %v1187_v15, %v1125_v12  ;;  %994 = vst [vmem:[%s2568_s2 + $0x48] sm:$0xff] %v930_v16  ;;  %v1055_v26 = vadd.f32 %v1054_v11, %v928_v58  ;;  %v748_v36 = vmul.f32 0.70710677, %v2066_v21  ;;  %v677_v55 = vmul.f32 0.5, %v2002_v22  ;;  %v2092_v35 = vpop.f32.mrf.mxu1 }
  0xf2   :  { %v2074_v29 = vpop.eup %1551  ;;  %v929_v59 = vmul.f32 %v865_v49, %v673_v57  ;;  %v868_v30 = vadd.f32 1.0, %v1550_v46  ;;  %1565 = verf.f32 %v745_v20  ;;  %v2077_v37 = vpop.f32.mrf.mxu0  ;;  %v2090_v56 = vmul.f32 %v892_v44, %v1952_v41 }
  0xf3   :  { %v1554_v31 = vpop.eup %1553  ;;  %v1189_v38 = vadd.f32 %v1188_v25, %v1126_v24  ;;  %v747_v43 = vmul.f32 0.70710677, %v2077_v37  ;;  %1567 = verf.f32 %v748_v36  ;;  %v1128_v58 = vmul.f32 %v930_v16, %v930_v16  ;;  %v2111_v20 = vpop.f32.mrf.mxu1 }
  0xf4   :  { %993 = vst [vmem:[%s2568_s2 + $0x40] sm:$0xff] %v929_v59  ;;  %v1056_v4 = vadd.f32 %v1055_v26, %v929_v59  ;;  %v1127_v34 = vmul.f32 %v929_v59, %v929_v59  ;;  %v932_v52 = vmul.f32 %v868_v30, %v676_v19  ;;  %v867_v48 = vadd.f32 1.0, %v1554_v31  ;;  %v2085_v53 = vpop.f32.mrf.mxu0  ;;  %1020 = vst [vmem:[%s2568_s2 + $0x118] sm:$0xff] %v2090_v56 }
  0xf5   :  { %v1556_v54 = vpop.eup %1555  ;;  %v750_v13 = vmul.f32 0.70710677, %v2085_v53  ;;  %v680_v57 = vmul.f32 0.5, %v2013_v32  ;;  %1569 = verf.f32 %v747_v43  ;;  %v679_v30 = vmul.f32 0.5, %v2032_v45 }
  0xf6   :  { %v1190_v40 = vadd.f32 %v1189_v38, %v1127_v34  ;;  %996 = vst [vmem:[%s2568_s2 + $0x58] sm:$0xff] %v932_v52  ;;  %v931_v62 = vmul.f32 %v867_v48, %v675_v27  ;;  %v1057_v63 = vadd.f32 %v1056_v4, %v930_v16  ;;  %v2097_v0 = vpop.f32.mrf.mxu0  ;;  %v870_v22 = vadd.f32 1.0, %v1556_v54 }
  0xf7   :  { %v1558_v2 = vpop.eup %1557  ;;  %v749_v41 = vmul.f32 0.70710677, %v2097_v0  ;;  %v1130_v32 = vmul.f32 %v932_v52, %v932_v52  ;;  %1571 = verf.f32 %v750_v13  ;;  %v682_v36 = vmul.f32 0.5, %v2041_v60  ;;  %v2128_v60 = vpop.f32.mrf.mxu1 }
  0xf8   :  { %995 = vst [vmem:[%s2568_s2 + $0x50] sm:$0xff] %v931_v62  ;;  %v1058_v7 = vadd.f32 %v1057_v63, %v931_v62  ;;  %v1129_v10 = vmul.f32 %v931_v62, %v931_v62  ;;  %v1191_v11 = vadd.f32 %v1190_v40, %v1128_v58  ;;  %v869_v12 = vadd.f32 1.0, %v1558_v2  ;;  %v2108_v15 = vpop.f32.mrf.mxu0 }
  0xf9   :  { %v1560_v16 = vpop.eup %1559  ;;  %v934_v49 = vmul.f32 %v870_v22, %v678_v42  ;;  %v752_v19 = vmul.f32 0.70710677, %v2108_v15  ;;  %1573 = verf.f32 %v749_v41  ;;  %v681_v48 = vmul.f32 0.5, %v2054_v8 }
  0xfa   :  { %v1192_v46 = vadd.f32 %v1191_v11, %v1129_v10  ;;  %v933_v24 = vmul.f32 %v869_v12, %v677_v55  ;;  %v1059_v25 = vadd.f32 %v1058_v7, %v932_v52  ;;  %v872_v26 = vadd.f32 1.0, %v1560_v16  ;;  %v2113_v27 = vpop.f32.mrf.mxu0  ;;  %v2143_v16 = vpop.f32.mrf.mxu1 }
  0xfb   :  { %v1562_v59 = vpop.eup %1561  ;;  %998 = vst [vmem:[%s2568_s2 + $0x68] sm:$0xff] %v934_v49  ;;  %v751_v31 = vmul.f32 0.70710677, %v2113_v27  ;;  %1575 = verf.f32 %v752_v19  ;;  %v1132_v54 = vmul.f32 %v934_v49, %v934_v49  ;;  %v684_v2 = vmul.f32 0.5, %v2066_v21 }
  0xfc   :  { %997 = vst [vmem:[%s2568_s2 + $0x60] sm:$0xff] %v933_v24  ;;  %v1060_v38 = vadd.f32 %v1059_v25, %v933_v24  ;;  %v1131_v42 = vmul.f32 %v933_v24, %v933_v24  ;;  %v1193_v43 = vadd.f32 %v1192_v46, %v1130_v32  ;;  %v936_v44 = vmul.f32 %v872_v26, %v680_v57  ;;  %v2124_v4 = vpop.f32.mrf.mxu0 }
  0xfd   :  { %v1564_v34 = vpop.eup %1563  ;;  %v871_v52 = vadd.f32 1.0, %v1562_v59  ;;  %v754_v45 = vmul.f32 0.70710677, %v2124_v4  ;;  %1577 = verf.f32 %v751_v31  ;;  %v683_v12 = vmul.f32 0.5, %v2077_v37 }
  0xfe   :  { %v1194_v55 = vadd.f32 %v1193_v43, %v1131_v42  ;;  %1000 = vst [vmem:[%s2568_s2 + $0x78] sm:$0xff] %v936_v44  ;;  %v1061_v13 = vadd.f32 %v1060_v38, %v934_v49  ;;  %v874_v58 = vadd.f32 1.0, %v1564_v34  ;;  %v2133_v40 = vpop.f32.mrf.mxu0  ;;  %v1134_v32 = vmul.f32 %v936_v44, %v936_v44 }
  0xff   :  { %v1566_v62 = vpop.eup %1565  ;;  %v935_v63 = vmul.f32 %v871_v52, %v679_v30  ;;  %v753_v8 = vmul.f32 0.70710677, %v2133_v40  ;;  %1579 = verf.f32 %v754_v45  ;;  %v686_v19 = vmul.f32 0.5, %v2085_v53 }
 0x100   :  { %v1195_v22 = vadd.f32 %v1194_v55, %v1132_v54  ;;  %v938_v57 = vmul.f32 %v874_v58, %v682_v36  ;;  %v873_v41 = vadd.f32 1.0, %v1566_v62  ;;  %v2137_v7 = vpop.f32.mrf.mxu0  ;;  %v1568_v21 = vpop.eup %1567  ;;  %v891_v37 = vadd.f32 1.0, %v2034_v47 }
 0x101   :  { %999 = vst [vmem:[%s2568_s2 + $0x70] sm:$0xff] %v935_v63  ;;  %v1062_v10 = vadd.f32 %v1061_v13, %v935_v63  ;;  %v1133_v11 = vmul.f32 %v935_v63, %v935_v63  ;;  %1581 = verf.f32 %v753_v8  ;;  %v756_v46 = vmul.f32 0.70710677, %v2137_v7 }
 0x102   :  { %1002 = vst [vmem:[%s2568_s2 + $0x88] sm:$0xff] %v938_v57  ;;  %v937_v49 = vmul.f32 %v873_v41, %v681_v48  ;;  %v2150_v24 = vpop.f32.mrf.mxu0  ;;  %v876_v59 = vadd.f32 1.0, %v1568_v21  ;;  %v1570_v30 = vpop.eup %1569  ;;  %v685_v31 = vmul.f32 0.5, %v2097_v0  ;;  %v688_v48 = vmul.f32 0.5, %v2108_v15 }
 0x103   :  { %v1196_v25 = vadd.f32 %v1195_v22, %v1133_v11  ;;  %v1063_v26 = vadd.f32 %v1062_v10, %v936_v44  ;;  %1583 = verf.f32 %v756_v46  ;;  %v755_v53 = vmul.f32 0.70710677, %v2150_v24  ;;  %v2160_v44 = vpop.f32.mrf.mxu1 }
 0x104   :  { %1001 = vst [vmem:[%s2568_s2 + $0x80] sm:$0xff] %v937_v49  ;;  %v1135_v36 = vmul.f32 %v937_v49, %v937_v49  ;;  %v940_v43 = vmul.f32 %v876_v59, %v684_v2  ;;  %v875_v34 = vadd.f32 1.0, %v1570_v30  ;;  %v2158_v52 = vpop.f32.mrf.mxu0  ;;  %v1572_v47 = vpop.eup %1571  ;;  %v2164_v45 = vmul.f32 %v891_v37, %v1962_v50 }
 0x105   :  { %v1064_v38 = vadd.f32 %v1063_v26, %v937_v49  ;;  %v1197_v42 = vadd.f32 %v1196_v25, %v1134_v32  ;;  %1585 = verf.f32 %v755_v53  ;;  %v894_v0 = vadd.f32 1.0, %v2043_v61 }
 0x106   :  { %v1136_v54 = vmul.f32 %v938_v57, %v938_v57  ;;  %1004 = vst [vmem:[%s2568_s2 + $0x98] sm:$0xff] %v940_v43  ;;  %v939_v13 = vmul.f32 %v875_v34, %v683_v12  ;;  %v1574_v62 = vpop.eup %1573  ;;  %v878_v63 = vadd.f32 1.0, %v1572_v47  ;;  %v687_v2 = vmul.f32 0.5, %v2113_v27  ;;  %1019 = vst [vmem:[%s2568_s2 + $0x110] sm:$0xff] %v2164_v45  ;;  %v2182_v41 = vpop.f32.mrf.mxu0 }
 0x107   :  { %v1198_v55 = vadd.f32 %v1197_v42, %v1135_v36  ;;  %v1065_v58 = vadd.f32 %v1064_v38, %v938_v57  ;;  %v2176_v50 = vmul.f32 %v894_v0, %v1964_v51  ;;  %v758_v61 = vmul.f32 0.70710677, %v2158_v52  ;;  %v2184_v27 = vpop.f32.mrf.mxu1 }
 0x108   :  { %1003 = vst [vmem:[%s2568_s2 + $0x90] sm:$0xff] %v939_v13  ;;  %v1137_v8 = vmul.f32 %v939_v13, %v939_v13  ;;  %v877_v57 = vadd.f32 1.0, %v1574_v62  ;;  %v1576_v10 = vpop.eup %1575  ;;  %v1138_v11 = vmul.f32 %v940_v43, %v940_v43  ;;  %v942_v12 = vmul.f32 %v878_v63, %v686_v19 }
 0x109   :  { %v1066_v15 = vadd.f32 %v1065_v58, %v939_v13  ;;  %v1199_v22 = vadd.f32 %v1198_v55, %v1136_v54  ;;  %1022 = vst [vmem:[%s2568_s2 + $0x128] sm:$0xff] %v2176_v50  ;;  %1587 = verf.f32 %v758_v61  ;;  %v893_v51 = vadd.f32 1.0, %v2047_v6  ;;  %v2203_v38 = vpop.f32.mrf.mxu1 }
 0x10a   :  { %v941_v32 = vmul.f32 %v877_v57, %v685_v31  ;;  %v880_v46 = vadd.f32 1.0, %v1576_v10  ;;  %v1578_v25 = vpop.eup %1577  ;;  %1006 = vst [vmem:[%s2568_s2 + $0xa8] sm:$0xff] %v942_v12  ;;  %v690_v26 = vmul.f32 0.5, %v2124_v4  ;;  %v689_v19 = vmul.f32 0.5, %v2133_v40 }
 0x10b   :  { %v1200_v21 = vadd.f32 %v1199_v22, %v1137_v8  ;;  %v1067_v49 = vadd.f32 %v1066_v15, %v940_v43  ;;  %v2197_v59 = vmul.f32 %v893_v51, %v1994_v14  ;;  %v757_v37 = vmul.f32 0.70710677, %v2182_v41  ;;  %v2210_v14 = vpop.f32.mrf.mxu0  ;;  %v2219_v8 = vpop.f32.mrf.mxu1 }
 0x10c   :  { %v1580_v30 = vpop.eup %1579  ;;  %1005 = vst [vmem:[%s2568_s2 + $0xa0] sm:$0xff] %v941_v32  ;;  %v1139_v36 = vmul.f32 %v941_v32, %v941_v32  ;;  %v944_v53 = vmul.f32 %v880_v46, %v688_v48  ;;  %v879_v4 = vadd.f32 1.0, %v1578_v25  ;;  %v692_v40 = vmul.f32 0.5, %v2137_v7 }
 0x10d   :  { %v1068_v6 = vadd.f32 %v1067_v49, %v941_v32  ;;  %v1201_v31 = vadd.f32 %v1200_v21, %v1138_v11  ;;  %v882_v43 = vadd.f32 1.0, %v1580_v30  ;;  %1021 = vst [vmem:[%s2568_s2 + $0x120] sm:$0xff] %v2197_v59  ;;  %1589 = verf.f32 %v757_v37  ;;  %v2247_v46 = vpop.f32.mrf.mxu1 }
 0x10e   :  { %v1582_v42 = vpop.eup %1581  ;;  %v1140_v34 = vmul.f32 %v942_v12, %v942_v12  ;;  %1008 = vst [vmem:[%s2568_s2 + $0xb8] sm:$0xff] %v944_v53  ;;  %v943_v54 = vmul.f32 %v879_v4, %v687_v2  ;;  %v691_v7 = vmul.f32 0.5, %v2150_v24  ;;  %v896_v13 = vadd.f32 1.0, %v2062_v17  ;;  %v2227_v24 = vpop.f32.mrf.mxu0 }
 0x10f   :  { %v1202_v47 = vadd.f32 %v1201_v31, %v1139_v36  ;;  %v1069_v48 = vadd.f32 %v1068_v6, %v942_v12  ;;  %v881_v0 = vadd.f32 1.0, %v1582_v42  ;;  %v946_v55 = vmul.f32 %v882_v43, %v690_v26 }
 0x110   :  { %v1584_v58 = vpop.eup %1583  ;;  %v760_v61 = vmul.f32 0.70710677, %v2210_v14  ;;  %v895_v15 = vadd.f32 1.0, %v2074_v29  ;;  %v1142_v22 = vmul.f32 %v944_v53, %v944_v53  ;;  %1007 = vst [vmem:[%s2568_s2 + $0xb0] sm:$0xff] %v943_v54  ;;  %v1141_v57 = vmul.f32 %v943_v54, %v943_v54 }
 0x111   :  { %v1203_v62 = vadd.f32 %v1202_v47, %v1140_v34  ;;  %v945_v63 = vmul.f32 %v881_v0, %v689_v19  ;;  %v1070_v2 = vadd.f32 %v1069_v48, %v943_v54  ;;  %1010 = vst [vmem:[%s2568_s2 + $0xc8] sm:$0xff] %v946_v55  ;;  %v884_v17 = vadd.f32 1.0, %v1584_v58 }
 0x112   :  { %v1586_v10 = vpop.eup %1585  ;;  %v2233_v11 = vmul.f32 %v896_v13, %v2020_v33  ;;  %1591 = verf.f32 %v760_v61  ;;  %v2236_v12 = vmul.f32 %v895_v15, %v2057_v9  ;;  %v759_v33 = vmul.f32 0.70710677, %v2227_v24 }
 0x113   :  { %1009 = vst [vmem:[%s2568_s2 + $0xc0] sm:$0xff] %v945_v63  ;;  %v1143_v29 = vmul.f32 %v945_v63, %v945_v63  ;;  %v1204_v51 = vadd.f32 %v1203_v62, %v1141_v57  ;;  %v1071_v21 = vadd.f32 %v1070_v2, %v944_v53  ;;  %v948_v32 = vmul.f32 %v884_v17, %v692_v40  ;;  %v2259_v40 = vpop.f32.mrf.mxu1 }
 0x114   :  { %v883_v49 = vadd.f32 1.0, %v1586_v10  ;;  %1024 = vst [vmem:[%s2568_s2 + $0x138] sm:$0xff] %v2233_v11  ;;  %1023 = vst [vmem:[%s2568_s2 + $0x130] sm:$0xff] %v2236_v12  ;;  %v694_v19 = vmul.f32 0.5, %v2158_v52  ;;  %v1144_v30 = vmul.f32 %v946_v55, %v946_v55  ;;  %1593 = verf.f32 %v759_v33 }
 0x115   :  { %v1072_v9 = vadd.f32 %v1071_v21, %v945_v63  ;;  %v1205_v25 = vadd.f32 %v1204_v51, %v1142_v22  ;;  %1012 = vst [vmem:[%s2568_s2 + $0xd8] sm:$0xff] %v948_v32  ;;  %v770_v6 = vmul.f32 0.70710677, %v1976_v1  ;;  %v769_v36 = vmul.f32 0.70710677, %v1999_v18  ;;  %v2275_v15 = vpop.f32.mrf.mxu1 }
 0x116   :  { %v947_v26 = vmul.f32 %v883_v49, %v691_v7  ;;  %v1588_v37 = vpop.eup %1587  ;;  %v772_v43 = vmul.f32 0.70710677, %v2028_v39  ;;  %v2262_v0 = vmul.f32 0.5, %v1976_v1  ;;  %v771_v54 = vmul.f32 0.70710677, %v2045_v3 }
 0x117   :  { %v1206_v31 = vadd.f32 %v1205_v25, %v1143_v29  ;;  %v1073_v53 = vadd.f32 %v1072_v9, %v946_v55  ;;  %v886_v4 = vadd.f32 1.0, %v1588_v37  ;;  %1595 = verf.f32 %v770_v6  ;;  %v2293_v25 = vpop.f32.mrf.mxu1 }
 0x118   :  { %1011 = vst [vmem:[%s2568_s2 + $0xd0] sm:$0xff] %v947_v26  ;;  %v1145_v42 = vmul.f32 %v947_v26, %v947_v26  ;;  %1597 = verf.f32 %v769_v36  ;;  %v774_v55 = vmul.f32 0.70710677, %v2072_v28  ;;  %v2268_v7 = vmul.f32 %v1981_v5, %v1981_v5 }
 0x119   :  { %v1074_v52 = vadd.f32 %v1073_v53, %v947_v26  ;;  %v1207_v34 = vadd.f32 %v1206_v31, %v1144_v30  ;;  %v950_v47 = vmul.f32 %v886_v4, %v694_v19  ;;  %1599 = verf.f32 %v772_v43 }
 0x11a   :  { %v1590_v48 = vpop.eup %1589  ;;  %v693_v58 = vmul.f32 0.5, %v2182_v41  ;;  %v1146_v63 = vmul.f32 %v948_v32, %v948_v32  ;;  %1601 = verf.f32 %v771_v54  ;;  %v773_v61 = vmul.f32 0.70710677, %v2092_v35 }
 0x11b   :  { %v1208_v13 = vadd.f32 %v1207_v34, %v1145_v42  ;;  %1014 = vst [vmem:[%s2568_s2 + $0xe8] sm:$0xff] %v950_v47  ;;  %v885_v62 = vadd.f32 1.0, %v1590_v48  ;;  %v1075_v1 = vadd.f32 %v1074_v52, %v948_v32  ;;  %v2279_v22 = vmul.f32 %v2005_v23, %v2005_v23  ;;  %v2309_v52 = vpop.f32.mrf.mxu1 }
 0x11c   :  { %1603 = verf.f32 %v774_v55  ;;  %v776_v57 = vmul.f32 0.70710677, %v2111_v20  ;;  %v2284_v17 = vmul.f32 %v2090_v56, %v2090_v56  ;;  %v775_v10 = vmul.f32 0.70710677, %v2128_v60 }
 0x11d   :  { %v949_v2 = vmul.f32 %v885_v62, %v693_v58  ;;  %v1209_v41 = vadd.f32 %v1208_v13, %v1146_v63  ;;  %1605 = verf.f32 %v773_v61  ;;  %v696_v21 = vmul.f32 0.5, %v2210_v14 }
 0x11e   :  { %1607 = verf.f32 %v776_v57  ;;  %v778_v32 = vmul.f32 0.70710677, %v2143_v16  ;;  %v777_v9 = vmul.f32 0.70710677, %v2160_v44  ;;  %v2297_v26 = vmul.f32 %v2164_v45, %v2164_v45 }
 0x11f   :  { %v1592_v29 = vpop.eup %1591  ;;  %1013 = vst [vmem:[%s2568_s2 + $0xe0] sm:$0xff] %v949_v2  ;;  %v1147_v51 = vmul.f32 %v949_v2, %v949_v2  ;;  %v1076_v49 = vadd.f32 %v1075_v1, %v949_v2  ;;  %1609 = verf.f32 %v775_v10  ;;  %v695_v19 = vmul.f32 0.5, %v2227_v24 }
 0x120   :  { %v888_v33 = vadd.f32 1.0, %v1592_v29  ;;  %v705_v37 = vmul.f32 0.5, %v1999_v18  ;;  %1611 = verf.f32 %v778_v32  ;;  %v780_v6 = vmul.f32 0.70710677, %v2184_v27 }
 0x121   :  { %v1210_v14 = vadd.f32 %v1209_v41, %v1147_v51  ;;  %1613 = verf.f32 %v777_v9  ;;  %v1594_v36 = vpop.eup %1593  ;;  %v708_v31 = vmul.f32 0.5, %v2028_v39  ;;  %v707_v53 = vmul.f32 0.5, %v2045_v3  ;;  %v2322_v41 = vpop.f32.mrf.mxu1 }
 0x122   :  { %v952_v30 = vmul.f32 %v888_v33, %v696_v21  ;;  %v779_v42 = vmul.f32 0.70710677, %v2203_v38  ;;  %v782_v4 = vmul.f32 0.70710677, %v2219_v8  ;;  %v1148_v43 = vmul.f32 %v950_v47, %v950_v47 }
 0x123   :  { %v887_v18 = vadd.f32 1.0, %v1594_v36  ;;  %v1077_v24 = vadd.f32 %v1076_v49, %v950_v47  ;;  %1615 = verf.f32 %v780_v6  ;;  %v710_v48 = vmul.f32 0.5, %v2072_v28 }
 0x124   :  { %1016 = vst [vmem:[%s2568_s2 + $0xf8] sm:$0xff] %v952_v30  ;;  %v1596_v34 = vpop.eup %1595  ;;  %1617 = verf.f32 %v779_v42  ;;  %v781_v39 = vmul.f32 0.70710677, %v2247_v46  ;;  %v784_v3 = vmul.f32 0.70710677, %v2259_v40  ;;  %v1211_v13 = vadd.f32 %v1210_v14, %v1148_v43  ;;  %v2345_v42 = vpop.f32.mrf.mxu1 }
 0x125   :  { %v1598_v54 = vpop.eup %1597  ;;  %v951_v55 = vmul.f32 %v887_v18, %v695_v19  ;;  %v898_v58 = vadd.f32 1.0, %v1596_v34  ;;  %1619 = verf.f32 %v782_v4  ;;  %v709_v47 = vmul.f32 0.5, %v2092_v35 }
 0x126   :  { %v1600_v62 = vpop.eup %1599  ;;  %v897_v63 = vadd.f32 1.0, %v1598_v54  ;;  %1621 = verf.f32 %v781_v39  ;;  %v783_v1 = vmul.f32 0.70710677, %v2275_v15  ;;  %v712_v35 = vmul.f32 0.5, %v2111_v20 }
 0x127   :  { %1015 = vst [vmem:[%s2568_s2 + $0xf0] sm:$0xff] %v951_v55  ;;  %v1078_v28 = vadd.f32 %v1077_v24, %v951_v55  ;;  %v1149_v61 = vmul.f32 %v951_v55, %v951_v55  ;;  %v2320_v2 = vmul.f32 %v898_v58, %v2262_v0  ;;  %v900_v57 = vadd.f32 1.0, %v1600_v62  ;;  %v1602_v10 = vpop.eup %1601  ;;  %v2377_v62 = vpop.f32.mrf.mxu1 }
 0x128   :  { %v2324_v29 = vmul.f32 %v897_v63, %v705_v37  ;;  %1623 = verf.f32 %v784_v3  ;;  %v786_v51 = vmul.f32 0.70710677, %v2293_v25  ;;  %v1150_v32 = vmul.f32 %v952_v30, %v952_v30 }
 0x129   :  { %v1604_v21 = vpop.eup %1603  ;;  %v1079_v49 = vadd.f32 %v1078_v28, %v952_v30  ;;  %v1212_v33 = vadd.f32 %v1211_v13, %v1149_v61  ;;  %1026 = vst [vmem:[%s2568_s2 + $0x148] sm:$0xff] %v2320_v2  ;;  %v2332_v0 = vmul.f32 %v900_v57, %v708_v31  ;;  %v899_v20 = vadd.f32 1.0, %v1602_v10 }
 0x12a   :  { %v1606_v9 = vpop.eup %1605  ;;  %1025 = vst [vmem:[%s2568_s2 + $0x140] sm:$0xff] %v2324_v29  ;;  %v902_v19 = vadd.f32 1.0, %v1604_v21  ;;  %v711_v37 = vmul.f32 0.5, %v2128_v60  ;;  %1625 = verf.f32 %v783_v1  ;;  %v714_v31 = vmul.f32 0.5, %v2143_v16 }
 0x12b   :  { %v1608_v14 = vpop.eup %1607  ;;  %v1080_v30 = vadd.f32 %v1079_v49, %v2005_v23  ;;  %v1213_v6 = vadd.f32 %v1212_v33, %v1150_v32  ;;  %1028 = vst [vmem:[%s2568_s2 + $0x158] sm:$0xff] %v2332_v0  ;;  %v901_v36 = vadd.f32 1.0, %v1606_v9  ;;  %v2347_v43 = vmul.f32 %v899_v20, %v707_v53  ;;  %v2405_v49 = vpop.f32.mrf.mxu1 }
 0x12c   :  { %v1610_v4 = vpop.eup %1609  ;;  %v2349_v18 = vmul.f32 %v902_v19, %v710_v48  ;;  %v904_v60 = vadd.f32 1.0, %v1608_v14  ;;  %1627 = verf.f32 %v786_v51  ;;  %v1155_v16 = vmul.f32 %v2197_v59, %v2197_v59 }
 0x12d   :  { %v1612_v24 = vpop.eup %1611  ;;  %v1081_v23 = vadd.f32 %v1080_v30, %v1981_v5  ;;  %v1214_v34 = vadd.f32 %v1213_v6, %v2279_v22  ;;  %v2353_v39 = vmul.f32 %v901_v36, %v709_v47  ;;  %v903_v3 = vadd.f32 1.0, %v1610_v4  ;;  %1027 = vst [vmem:[%s2568_s2 + $0x150] sm:$0xff] %v2347_v43 }
 0x12e   :  { %v1614_v54 = vpop.eup %1613  ;;  %1030 = vst [vmem:[%s2568_s2 + $0x168] sm:$0xff] %v2349_v18  ;;  %v2365_v5 = vmul.f32 %v904_v60, %v712_v35  ;;  %v906_v22 = vadd.f32 1.0, %v1612_v24  ;;  %v713_v53 = vmul.f32 0.5, %v2160_v44  ;;  %v716_v58 = vmul.f32 0.5, %v2184_v27  ;;  %v2438_v60 = vpop.f32.mrf.mxu1 }
 0x12f   :  { %v1082_v48 = vadd.f32 %v1081_v23, %v2164_v45  ;;  %v1215_v55 = vadd.f32 %v1214_v34, %v2268_v7  ;;  %1029 = vst [vmem:[%s2568_s2 + $0x160] sm:$0xff] %v2353_v39  ;;  %v2374_v13 = vmul.f32 %v903_v3, %v711_v37  ;;  %v905_v45 = vadd.f32 1.0, %v1614_v54 }
 0x130   :  { %v1616_v63 = vpop.eup %1615  ;;  %1032 = vst [vmem:[%s2568_s2 + $0x178] sm:$0xff] %v2365_v5  ;;  %v2383_v44 = vmul.f32 %v906_v22, %v714_v31  ;;  %v715_v7 = vmul.f32 0.5, %v2203_v38  ;;  %v785_v47 = vmul.f32 0.70710677, %v2309_v52  ;;  %v718_v57 = vmul.f32 0.5, %v2219_v8 }
 0x131   :  { %v1618_v1 = vpop.eup %1617  ;;  %v1083_v28 = vadd.f32 %v1082_v48, %v2090_v56  ;;  %v1216_v27 = vadd.f32 %v1215_v55, %v2297_v26  ;;  %1031 = vst [vmem:[%s2568_s2 + $0x170] sm:$0xff] %v2374_v13  ;;  %v908_v61 = vadd.f32 1.0, %v1616_v63  ;;  %v2398_v38 = vmul.f32 %v905_v45, %v713_v53 }
 0x132   :  { %v1620_v10 = vpop.eup %1619  ;;  %1034 = vst [vmem:[%s2568_s2 + $0x188] sm:$0xff] %v2383_v44  ;;  %v907_v35 = vadd.f32 1.0, %v1618_v1  ;;  %v717_v56 = vmul.f32 0.5, %v2247_v46  ;;  %1629 = verf.f32 %v785_v47  ;;  %v720_v46 = vmul.f32 0.5, %v2259_v40 }
 0x133   :  { %v1622_v26 = vpop.eup %1621  ;;  %v1217_v51 = vadd.f32 %v1216_v27, %v2284_v17  ;;  %v1084_v21 = vadd.f32 %v1083_v28, %v2197_v59  ;;  %v2403_v32 = vmul.f32 %v908_v61, %v716_v58  ;;  %v910_v8 = vadd.f32 1.0, %v1620_v10  ;;  %1033 = vst [vmem:[%s2568_s2 + $0x180] sm:$0xff] %v2398_v38 }
 0x134   :  { %v2411_v33 = vmul.f32 %v907_v35, %v715_v7  ;;  %v909_v9 = vadd.f32 1.0, %v1622_v26  ;;  %v1156_v17 = vmul.f32 %v2176_v50, %v2176_v50  ;;  %v719_v30 = vmul.f32 0.5, %v2275_v15 }
 0x135   :  { %v1624_v20 = vpop.eup %1623  ;;  %v1085_v59 = vadd.f32 %v1084_v21, %v2176_v50  ;;  %v1218_v19 = vadd.f32 %v1217_v51, %v1155_v16  ;;  %1036 = vst [vmem:[%s2568_s2 + $0x198] sm:$0xff] %v2403_v32  ;;  %v2421_v37 = vmul.f32 %v910_v8, %v718_v57  ;;  %v788_v50 = vmul.f32 0.70710677, %v2322_v41 }
 0x136   :  { %1035 = vst [vmem:[%s2568_s2 + $0x190] sm:$0xff] %v2411_v33  ;;  %v2427_v40 = vmul.f32 %v909_v9, %v717_v56  ;;  %v912_v14 = vadd.f32 1.0, %v1624_v20  ;;  %v1157_v36 = vmul.f32 %v2236_v12, %v2236_v12  ;;  %v722_v23 = vmul.f32 0.5, %v2293_v25 }
 0x137   :  { %v1626_v6 = vpop.eup %1625  ;;  %v1086_v31 = vadd.f32 %v1085_v59, %v2236_v12  ;;  %v1219_v4 = vadd.f32 %v1218_v19, %v1156_v17  ;;  %1038 = vst [vmem:[%s2568_s2 + $0x1a8] sm:$0xff] %v2421_v37  ;;  %1631 = verf.f32 %v788_v50  ;;  %v1158_v34 = vmul.f32 %v2233_v11, %v2233_v11 }
 0x138   :  { %1037 = vst [vmem:[%s2568_s2 + $0x1a0] sm:$0xff] %v2427_v40  ;;  %v2444_v15 = vmul.f32 %v912_v14, %v720_v46  ;;  %v911_v24 = vadd.f32 1.0, %v1626_v6  ;;  %v787_v16 = vmul.f32 0.70710677, %v2345_v42  ;;  %v790_v25 = vmul.f32 0.70710677, %v2377_v62 }
 0x139   :  { %v1628_v12 = vpop.eup %1627  ;;  %v1087_v3 = vadd.f32 %v1086_v31, %v2233_v11  ;;  %v1220_v54 = vadd.f32 %v1219_v4, %v1157_v36  ;;  %v1159_v55 = vmul.f32 %v2324_v29, %v2324_v29  ;;  %v656_v11 = vpop.f32.mrf.mxu1  ;;  %v789_v45 = vmul.f32 0.70710677, %v2405_v49 }
 0x13a   :  { %1040 = vst [vmem:[%s2568_s2 + $0x1b8] sm:$0xff] %v2444_v15  ;;  %v2455_v22 = vmul.f32 %v911_v24, %v719_v30  ;;  %v914_v53 = vadd.f32 1.0, %v1628_v12  ;;  %1633 = verf.f32 %v787_v16  ;;  %v1160_v7 = vmul.f32 %v2320_v2, %v2320_v2 }
 0x13b   :  { %v1088_v48 = vadd.f32 %v1087_v3, %v2324_v29  ;;  %v1221_v58 = vadd.f32 %v1220_v54, %v1158_v34  ;;  %1635 = verf.f32 %v790_v25  ;;  %v792_v29 = vmul.f32 0.70710677, %v2438_v60 }
 0x13c   :  { %1039 = vst [vmem:[%s2568_s2 + $0x1b0] sm:$0xff] %v2455_v22  ;;  %v2465_v63 = vmul.f32 %v914_v53, %v722_v23  ;;  %v721_v28 = vmul.f32 0.5, %v2309_v52  ;;  %1637 = verf.f32 %v789_v45  ;;  %v791_v27 = vmul.f32 0.70710677, %v656_v11 }
 0x13d   :  { %v1222_v47 = vadd.f32 %v1221_v58, %v1159_v55  ;;  %v1089_v1 = vadd.f32 %v1088_v48, %v2320_v2  ;;  %v1161_v10 = vmul.f32 %v2347_v43, %v2347_v43  ;;  %1639 = verf.f32 %v792_v29 }
 0x13e   :  { %1042 = vst [vmem:[%s2568_s2 + $0x1c8] sm:$0xff] %v2465_v63  ;;  %1641 = verf.f32 %v791_v27  ;;  %v1162_v56 = vmul.f32 %v2332_v0, %v2332_v0  ;;  %v1163_v8 = vmul.f32 %v2353_v39, %v2353_v39  ;;  %v1164_v20 = vmul.f32 %v2349_v18, %v2349_v18 }
 0x13f   :  { %v1630_v61 = vpop.eup %1629  ;;  %v1090_v57 = vadd.f32 %v1089_v1, %v2347_v43  ;;  %v1223_v35 = vadd.f32 %v1222_v47, %v1160_v7  ;;  %v724_v43 = vmul.f32 0.5, %v2322_v41  ;;  %v723_v30 = vmul.f32 0.5, %v2345_v42 }
 0x140   :  { %v913_v2 = vadd.f32 1.0, %v1630_v61  ;;  %v726_v41 = vmul.f32 0.5, %v2377_v62  ;;  %v1166_v31 = vmul.f32 %v2365_v5, %v2365_v5  ;;  %v1167_v23 = vmul.f32 %v2398_v38, %v2398_v38 }
 0x141   :  { %v1224_v26 = vadd.f32 %v1223_v35, %v1161_v10  ;;  %v1091_v51 = vadd.f32 %v1090_v57, %v2332_v0  ;;  %v728_v54 = vmul.f32 0.5, %v2438_v60  ;;  %v727_v25 = vmul.f32 0.5, %v656_v11 }
 0x142   :  { %v2483_v21 = vmul.f32 %v913_v2, %v721_v28  ;;  %v1168_v55 = vmul.f32 %v2383_v44, %v2383_v44  ;;  %v1169_v7 = vmul.f32 %v2411_v33, %v2411_v33  ;;  %v1170_v29 = vmul.f32 %v2403_v32, %v2403_v32 }
 0x143   :  { %v1092_v52 = vadd.f32 %v1091_v51, %v2353_v39  ;;  %v1225_v9 = vadd.f32 %v1224_v26, %v1162_v56  ;;  %v1165_v39 = vmul.f32 %v2374_v13, %v2374_v13  ;;  %v1171_v61 = vmul.f32 %v2427_v40, %v2427_v40 }
 0x144   :  { %1041 = vst [vmem:[%s2568_s2 + $0x1c0] sm:$0xff] %v2483_v21  ;;  %v1632_v46 = vpop.eup %1631  ;;  %v1172_v10 = vmul.f32 %v2421_v37, %v2421_v37  ;;  %v1173_v56 = vmul.f32 %v2455_v22, %v2455_v22  ;;  %v1174_v51 = vmul.f32 %v2444_v15, %v2444_v15 }
 0x145   :  { %v1226_v0 = vadd.f32 %v1225_v9, %v1163_v8  ;;  %v1093_v17 = vadd.f32 %v1092_v52, %v2349_v18  ;;  %v916_v59 = vadd.f32 1.0, %v1632_v46  ;;  %v1175_v9 = vmul.f32 %v2483_v21, %v2483_v21 }
 0x147   :  { %v1094_v19 = vadd.f32 %v1093_v17, %v2374_v13  ;;  %v1227_v14 = vadd.f32 %v1226_v0, %v1164_v20  ;;  %v1634_v50 = vpop.eup %1633  ;;  %v2500_v6 = vmul.f32 %v916_v59, %v724_v43  ;;  %v725_v13 = vmul.f32 0.5, %v2405_v49 }
 0x148   :  { %v1636_v36 = vpop.eup %1635  ;;  %v915_v24 = vadd.f32 1.0, %v1634_v50 }
 0x149   :  { %v1228_v4 = vadd.f32 %v1227_v14, %v1165_v39  ;;  %v1095_v18 = vadd.f32 %v1094_v19, %v2365_v5  ;;  %1044 = vst [vmem:[%s2568_s2 + $0x1d8] sm:$0xff] %v2500_v6  ;;  %v918_v42 = vadd.f32 1.0, %v1636_v36  ;;  %v1638_v62 = vpop.eup %1637  ;;  %v1178_v59 = vmul.f32 %v2500_v6, %v2500_v6 }
 0x14a   :  { %v979_v3 = vmul.f32 %v915_v24, %v723_v30  ;;  %v1640_v5 = vpop.eup %1639  ;;  %v917_v53 = vadd.f32 1.0, %v1638_v62 }
 0x14b   :  { %v1096_v12 = vadd.f32 %v1095_v18, %v2398_v38  ;;  %v1229_v34 = vadd.f32 %v1228_v4, %v1166_v31  ;;  %v982_v16 = vmul.f32 %v918_v42, %v726_v41  ;;  %v1642_v48 = vpop.eup %1641  ;;  %v920_v38 = vadd.f32 1.0, %v1640_v5 }
 0x14c   :  { %1043 = vst [vmem:[%s2568_s2 + $0x1d0] sm:$0xff] %v979_v3  ;;  %v981_v49 = vmul.f32 %v917_v53, %v725_v13  ;;  %v919_v60 = vadd.f32 1.0, %v1642_v48  ;;  %v1177_v0 = vmul.f32 %v979_v3, %v979_v3 }
 0x14d   :  { %v1230_v58 = vadd.f32 %v1229_v34, %v1167_v23  ;;  %v1097_v45 = vadd.f32 %v1096_v12, %v2383_v44  ;;  %1046 = vst [vmem:[%s2568_s2 + $0x1e8] sm:$0xff] %v982_v16  ;;  %v984_v1 = vmul.f32 %v920_v38, %v728_v54 }
 0x14e   :  { %1045 = vst [vmem:[%s2568_s2 + $0x1e0] sm:$0xff] %v981_v49  ;;  %v983_v44 = vmul.f32 %v919_v60, %v727_v25  ;;  %v1179_v14 = vmul.f32 %v981_v49, %v981_v49 }
 0x14f   :  { %v1098_v11 = vadd.f32 %v1097_v45, %v2411_v33  ;;  %v1231_v47 = vadd.f32 %v1230_v58, %v1168_v55  ;;  %1048 = vst [vmem:[%s2568_s2 + $0x1f8] sm:$0xff] %v984_v1  ;;  %v1182_v18 = vmul.f32 %v984_v1, %v984_v1 }
 0x150   :  { %1047 = vst [vmem:[%s2568_s2 + $0x1f0] sm:$0xff] %v983_v44  ;;  %v1181_v31 = vmul.f32 %v983_v44, %v983_v44 }
 0x151   :  { %v1232_v28 = vadd.f32 %v1231_v47, %v1169_v7  ;;  %v1099_v27 = vadd.f32 %v1098_v11, %v2403_v32 }
 0x153   :  { %v1100_v33 = vadd.f32 %v1099_v27, %v2427_v40  ;;  %v1233_v57 = vadd.f32 %v1232_v28, %v1170_v29 }
 0x155   :  { %v1234_v35 = vadd.f32 %v1233_v57, %v1171_v61  ;;  %v1101_v32 = vadd.f32 %v1100_v33, %v2421_v37  ;;  %v1176_v37 = vmul.f32 %v2465_v63, %v2465_v63 }
 0x157   :  { %v1102_v2 = vadd.f32 %v1101_v32, %v2455_v22  ;;  %v1235_v26 = vadd.f32 %v1234_v35, %v1172_v10 }
 0x159   :  { %v1236_v52 = vadd.f32 %v1235_v26, %v1173_v56  ;;  %v1103_v8 = vadd.f32 %v1102_v2, %v2444_v15 }
 0x15b   :  { %v1104_v40 = vadd.f32 %v1103_v8, %v2483_v21  ;;  %v1237_v43 = vadd.f32 %v1236_v52, %v1174_v51  ;;  %v1180_v21 = vmul.f32 %v982_v16, %v982_v16 }
 0x15d   :  { %v1238_v46 = vadd.f32 %v1237_v43, %v1175_v9  ;;  %v1105_v20 = vadd.f32 %v1104_v40, %v2465_v63 }
 0x15f   :  { %v1106_v22 = vadd.f32 %v1105_v20, %v979_v3  ;;  %v1239_v17 = vadd.f32 %v1238_v46, %v1176_v37 }
 0x161   :  { %v1240_v19 = vadd.f32 %v1239_v17, %v1177_v0  ;;  %v1107_v15 = vadd.f32 %v1106_v22, %v2500_v6 }
 0x163   :  { %v1108_v39 = vadd.f32 %v1107_v15, %v981_v49  ;;  %v1241_v30 = vadd.f32 %v1240_v19, %v1178_v59 }
 0x165   :  { %v1242_v50 = vadd.f32 %v1241_v30, %v1179_v14  ;;  %v1109_v41 = vadd.f32 %v1108_v39, %v982_v16 }
 0x167   :  { %v1110_v36 = vadd.f32 %v1109_v41, %v983_v44  ;;  %v1243_v4 = vadd.f32 %v1242_v50, %v1180_v21 }
 0x169   :  { %v1111_v63 = vadd.f32 %v1110_v36, %v984_v1  ;;  %v1244_v24 = vadd.f32 %v1243_v4, %v1181_v31 }
 0x16b   :  { %v1112_v23 = vrot.slane %v1111_v63, 4  ;;  %v1245_v42 = vadd.f32 %v1244_v24, %v1182_v18 }
 0x16d   :  { %v1113_v13 = vadd.f32 %v1112_v23, %v1111_v63  ;;  %v1246_v62 = vrot.slane %v1245_v42, 4 }
 0x16f   :  { %v1114_v12 = vrot.slane %v1113_v13, 2  ;;  %v1247_v34 = vadd.f32 %v1246_v62, %v1245_v42 }
 0x171   :  { %v1115_v3 = vadd.f32 %v1114_v12, %v1113_v13  ;;  %v1248_v6 = vrot.slane %v1247_v34, 2 }
 0x173   :  { %v1116_v54 = vrot.slane %v1115_v3, 1  ;;  %v1249_v5 = vadd.f32 %v1248_v6, %v1247_v34 }
 0x175   :  { %v1117_v53 = vadd.f32 %v1116_v54, %v1115_v3  ;;  %v1250_v25 = vrot.slane %v1249_v5, 1 }
 0x177   :  { %1118 = vst [vmem:[%s2569_s3] sm:$0x1] %v1117_v53  ;;  %v1251_v16 = vadd.f32 %v1250_v25, %v1249_v5 }
 0x179   :  { %1252 = vst [vmem:[%s2570_s4] sm:$0x1] %v1251_v16 }

</bundles_post_ra>
